<compile_context>
chip_gen: v7x
topology: tpu7x:2x2x1
jax: 0.10.0
libtpu: 0.0.40
codegen_flags: <defaults>
</compile_context>

<pallas_src>
import functools

import jax
import jax.numpy as jnp
import numpy as np
from jax.experimental import pallas as pl
from jax.experimental.pallas import tpu as pltpu


def _style_rand_kernel(x_ref, aug_ref, o_ref, *, eps, inv_l, inv_lm1):
    # x_ref:   (Nb, L, Cb)   activations
    # aug_ref: (Nb, 3, Cb)   row 0 = aug_mean, row 1 = aug_var, row 2 = alpha
    # o_ref:   (Nb, L, Cb)
    x = x_ref[...].astype(jnp.float32)

    # Single pass over x for per-(n, c) stats (reduction along sublanes).
    s = jnp.sum(x, axis=1, keepdims=True)             # (Nb, 1, Cb)
    ss = jnp.sum(x * x, axis=1, keepdims=True)        # (Nb, 1, Cb)
    mean = s * inv_l
    # torch.var default is unbiased (divide by L - 1); L == 1 -> nan/inf,
    # matching torch.  maximum() only guards against tiny negative values
    # from cancellation in the single-pass formula.
    var = jnp.maximum((ss - s * mean) * inv_lm1, 0.0)

    aug = aug_ref[...].astype(jnp.float32)            # (Nb, 3, Cb)
    aug_m = aug[:, 0:1, :]
    aug_v = aug[:, 1:2, :]
    alpha = aug[:, 2:3, :]

    mean_b = mean + alpha * (aug_m - mean)            # (1-a)*mean + a*aug_mean
    var_b = var + alpha * (aug_v - var)               # (1-a)*var  + a*aug_var

    # Fused normalize + de-normalize: one per-channel scale/bias (O(Cb) EUP),
    # then a single FMA per element, no block-sized temp kept alive.
    scale = jnp.sqrt(var_b + eps) * jax.lax.rsqrt(var + eps)   # (Nb, 1, Cb)
    bias = mean_b - mean * scale                               # (Nb, 1, Cb)
    o_ref[...] = (x * scale + bias).astype(o_ref.dtype)


def _vmem_capacity_bytes():
    """Physical VMEM per core (v5e/v6e: 128 MiB, v7x: 64 MiB)."""
    try:
        cap = int(pltpu.get_tpu_info().vmem_capacity_bytes)
        if cap > 0:
            return cap
    except Exception:
        pass
    return 64 << 20  # conservative default (v7x)


def _pick_tiling(N, L, C, itemsize):
    """Choose (samples-per-block, channels-per-block, vmem_limit_bytes)."""
    elt = max(int(itemsize), 4)  # compute happens in f32
    vmem_cap = _vmem_capacity_bytes()
    # ~8 MiB blocks on v7x (64 MiB VMEM), up to 16 MiB on v5e/v6e (128 MiB).
    budget = max(4 << 20, min(16 << 20, vmem_cap // 8))

    per_sample = L * C * elt
    if per_sample <= budget:
        c_blk = C                                        # full, contiguous rows
        nb = max(1, min(N, budget // max(per_sample, 1)))
    else:
        nb = 1
        c_blk = (budget // (L * elt)) // 128 * 128       # lane-dense 128-multiple
        c_blk = min(max(c_blk, 128), C)

    # Guarantee >= 2 parallel grid points so both v7x TensorCores get work.
    if pl.cdiv(N, nb) * pl.cdiv(C, c_blk) < 2:
        if N >= 2:
            nb = pl.cdiv(N, 2)
        elif C >= 256 and c_blk == C:
            c_blk = min(C, pl.cdiv(C // 2, 128) * 128)

    blk_bytes = nb * L * c_blk * elt
    vmem_limit = max(32 << 20, 6 * blk_bytes)            # dbl-buffered in+out + slack
    vmem_limit = min(vmem_limit, vmem_cap - (8 << 20))   # headroom under physical VMEM
    vmem_limit = max(vmem_limit, 16 << 20)
    return nb, c_blk, int(vmem_limit)


def style_randomization(x, aug_mean, aug_var, alpha, *, eps=1e-5, training=True):
    """x: (N, L, C); aug_mean/aug_var: (N, C, 1) or (N, C); alpha: (N, 1, 1) or (N,)."""
    if not training:
        # eval mode: permute + permute back == identity
        return x

    N, L, C = x.shape
    # One small side input: rows [aug_mean, aug_var, alpha], C on lanes.
    aug = jnp.stack(
        [
            jnp.reshape(aug_mean, (N, C)),
            jnp.reshape(aug_var, (N, C)),
            jnp.broadcast_to(jnp.reshape(alpha, (N, 1)), (N, C)),
        ],
        axis=1,
    ).astype(jnp.float32)                                          # (N, 3, C)

    nb, c_blk, vmem_limit = _pick_tiling(N, L, C, jnp.dtype(x.dtype).itemsize)
    grid = (pl.cdiv(N, nb), pl.cdiv(C, c_blk))

    inv_l = 1.0 / float(L)
    # torch parity: unbiased var with L == 1 yields nan (0 * inf).
    inv_lm1 = 1.0 / float(L - 1) if L > 1 else float("inf")

    kernel = functools.partial(
        _style_rand_kernel, eps=float(eps), inv_l=inv_l, inv_lm1=inv_lm1
    )

    return pl.pallas_call(
        kernel,
        out_shape=jax.ShapeDtypeStruct((N, L, C), x.dtype),
        grid_spec=pltpu.PrefetchScalarGridSpec(
            num_scalar_prefetch=0,
            grid=grid,
            in_specs=[
                pl.BlockSpec((nb, L, c_blk), lambda n, c: (n, 0, c)),   # x
                pl.BlockSpec((nb, 3, c_blk), lambda n, c: (n, 0, c)),   # aug
            ],
            out_specs=pl.BlockSpec((nb, L, c_blk), lambda n, c: (n, 0, c)),
        ),
        compiler_params=pltpu.CompilerParams(
            dimension_semantics=("parallel", "parallel"),
            vmem_limit_bytes=vmem_limit,
        ),
    )(x, aug)


def _reference(x, aug_mean, aug_var, alpha, eps=1e-5):
    x_ncl = jnp.transpose(x, (0, 2, 1))
    mean = jnp.mean(x_ncl, axis=-1, keepdims=True)
    var = jnp.var(x_ncl, axis=-1, keepdims=True, ddof=1)
    xn = (x_ncl - mean) / jnp.sqrt(var + eps)
    mean_b = (1.0 - alpha) * mean + alpha * aug_mean
    var_b = (1.0 - alpha) * var + alpha * aug_var
    return jnp.transpose(xn * jnp.sqrt(var_b + eps) + mean_b, (0, 2, 1))


if __name__ == "__main__":
    key = jax.random.PRNGKey(0)

    def _run_case(case_key, N, L, C, K=1):
        k_x, k_m, k_v, k_a = jax.random.split(case_key, 4)
        x = jax.random.normal(k_x, (N, L, C), dtype=jnp.float32)
        aug_mean = jax.random.normal(k_m, (N, C, 1), dtype=jnp.float32)
        aug_var = jax.random.uniform(k_v, (N, C, 1), dtype=jnp.float32) + 0.5
        # alpha = rand(N,1,1) / K, generated deterministically (replaces torch.rand)
        alpha = jax.random.uniform(k_a, (N, 1, 1), dtype=jnp.float32) / K
        # TODO(synk): idx_swap = torch.randperm(N) in the reference is dead code and is omitted.
        out = jax.block_until_ready(
            style_randomization(x, aug_mean, aug_var, alpha, training=True)
        )
        ref = _reference(x, aug_mean, aug_var, alpha)
        np.testing.assert_allclose(
            np.asarray(out), np.asarray(ref), rtol=1e-5, atol=1e-5
        )

    k1, k2 = jax.random.split(key)
    _run_case(k1, N=2, L=16, C=8)      # tiny MFN-like shape (C < 128, full-C block)
    _run_case(k2, N=4, L=16, C=256)    # sample-batched, lane-dense, 2-point grid

    print("KERNEL_OK")
</pallas_src>

<mosaic_0001>
module attributes {stable_mosaic.version = 11 : i64} {
  func.func @_style_rand_kernel(%arg0: i32, %arg1: i32, %arg2: memref<1x16x8xf32, #tpu.memory_space<vmem>>, %arg3: memref<1x3x8xf32, #tpu.memory_space<vmem>>, %arg4: memref<1x16x8xf32, #tpu.memory_space<vmem>>) attributes {dimension_semantics = [#tpu.dimension_semantics<parallel>, #tpu.dimension_semantics<parallel>], iteration_bounds = array<i64: 2, 1>, scalar_prefetch = 0 : i64, scratch_operands = 0 : i64, tpu.core_type = #tpu.core_type<tc>, window_params = [{transform_indices = @transform_0, window_bounds = array<i64: 1, 16, 8>}, {transform_indices = @transform_1, window_bounds = array<i64: 1, 3, 8>}, {transform_indices = @transform_2, window_bounds = array<i64: 1, 16, 8>}]} {
    %c0 = arith.constant 0 : index
    %c0_0 = arith.constant 0 : index
    %c0_1 = arith.constant 0 : index
    %0 = vector.load %arg2[%c0, %c0_0, %c0_1] : memref<1x16x8xf32, #tpu.memory_space<vmem>>, vector<1x16x8xf32>
    %cst = arith.constant dense<0.000000e+00> : vector<1x8xf32>
    %1 = vector.multi_reduction <add>, %0, %cst [1] : vector<1x16x8xf32> to vector<1x8xf32>
    %2 = vector.shape_cast %1 : vector<1x8xf32> to vector<1x1x8xf32>
    %3 = arith.mulf %0, %0 : vector<1x16x8xf32>
    %cst_2 = arith.constant dense<0.000000e+00> : vector<1x8xf32>
    %4 = vector.multi_reduction <add>, %3, %cst_2 [1] : vector<1x16x8xf32> to vector<1x8xf32>
    %5 = vector.shape_cast %4 : vector<1x8xf32> to vector<1x1x8xf32>
    %cst_3 = arith.constant 6.250000e-02 : f32
    %6 = vector.broadcast %cst_3 : f32 to vector<1x1x8xf32>
    %7 = arith.mulf %2, %6 : vector<1x1x8xf32>
    %8 = arith.mulf %2, %7 : vector<1x1x8xf32>
    %9 = arith.subf %5, %8 : vector<1x1x8xf32>
    %cst_4 = arith.constant 0.0666666701 : f32
    %10 = vector.broadcast %cst_4 : f32 to vector<1x1x8xf32>
    %11 = arith.mulf %9, %10 : vector<1x1x8xf32>
    %cst_5 = arith.constant 0.000000e+00 : f32
    %12 = vector.broadcast %cst_5 : f32 to vector<1x1x8xf32>
    %13 = arith.maximumf %11, %12 : vector<1x1x8xf32>
    %c0_6 = arith.constant 0 : index
    %c0_7 = arith.constant 0 : index
    %c0_8 = arith.constant 0 : index
    %14 = vector.load %arg3[%c0_6, %c0_7, %c0_8] : memref<1x3x8xf32, #tpu.memory_space<vmem>>, vector<1x3x8xf32>
    %15 = vector.extract_strided_slice %14 {offsets = [0, 0, 0], sizes = [1, 1, 8], strides = [1, 1, 1]} : vector<1x3x8xf32> to vector<1x1x8xf32>
    %16 = vector.extract_strided_slice %14 {offsets = [0, 1, 0], sizes = [1, 1, 8], strides = [1, 1, 1]} : vector<1x3x8xf32> to vector<1x1x8xf32>
    %17 = vector.extract_strided_slice %14 {offsets = [0, 2, 0], sizes = [1, 1, 8], strides = [1, 1, 1]} : vector<1x3x8xf32> to vector<1x1x8xf32>
    %18 = arith.subf %15, %7 : vector<1x1x8xf32>
    %19 = arith.mulf %17, %18 : vector<1x1x8xf32>
    %20 = arith.addf %7, %19 : vector<1x1x8xf32>
    %21 = arith.subf %16, %13 : vector<1x1x8xf32>
    %22 = arith.mulf %17, %21 : vector<1x1x8xf32>
    %23 = arith.addf %13, %22 : vector<1x1x8xf32>
    %cst_9 = arith.constant 9.99999974E-6 : f32
    %24 = vector.broadcast %cst_9 : f32 to vector<1x1x8xf32>
    %25 = arith.addf %23, %24 : vector<1x1x8xf32>
    %26 = math.sqrt %25 : vector<1x1x8xf32>
    %cst_10 = arith.constant 9.99999974E-6 : f32
    %27 = vector.broadcast %cst_10 : f32 to vector<1x1x8xf32>
    %28 = arith.addf %13, %27 : vector<1x1x8xf32>
    %29 = math.rsqrt %28 : vector<1x1x8xf32>
    %30 = arith.mulf %26, %29 : vector<1x1x8xf32>
    %31 = arith.mulf %7, %30 : vector<1x1x8xf32>
    %32 = arith.subf %20, %31 : vector<1x1x8xf32>
    %33 = vector.broadcast %30 : vector<1x1x8xf32> to vector<1x16x8xf32>
    %34 = arith.mulf %0, %33 : vector<1x16x8xf32>
    %35 = vector.broadcast %32 : vector<1x1x8xf32> to vector<1x16x8xf32>
    %36 = arith.addf %34, %35 : vector<1x16x8xf32>
    %c0_11 = arith.constant 0 : index
    %c0_12 = arith.constant 0 : index
    %c0_13 = arith.constant 0 : index
    %37 = vector.load %arg4[%c0_11, %c0_12, %c0_13] : memref<1x16x8xf32, #tpu.memory_space<vmem>>, vector<1x16x8xf32>
    tpu.vector_store %arg4[%c0_11, %c0_12, %c0_13], %36 {strides = array<i32>} : memref<1x16x8xf32, #tpu.memory_space<vmem>>, vector<1x16x8xf32>,
    return
  }
  func.func @transform_0(%arg0: i32, %arg1: i32) -> (i32, i32, i32) {
    %c0_i32 = arith.constant 0 : i32
    %c0_i32_0 = arith.constant 0 : i32
    return %arg0, %c0_i32, %arg1 : i32, i32, i32
  }
  func.func @transform_1(%arg0: i32, %arg1: i32) -> (i32, i32, i32) {
    %c0_i32 = arith.constant 0 : i32
    %c0_i32_0 = arith.constant 0 : i32
    return %arg0, %c0_i32, %arg1 : i32, i32, i32
  }
  func.func @transform_2(%arg0: i32, %arg1: i32) -> (i32, i32, i32) {
    %c0_i32 = arith.constant 0 : i32
    %c0_i32_0 = arith.constant 0 : i32
    return %arg0, %c0_i32, %arg1 : i32, i32, i32
  }
}

</mosaic_0001>

<bundles_post_ra>
// kernel: tpu_custom_call.1
= control target key start
LH: loop header
LB: loop body
LE: loop exit
PB: predicated region body
PF: predicated region fallthrough
CT: control target
= control target key end

     0   :  { %s450_s9 = smov 0   ;;  %s452_s10 = smov 0   ;;  %s500_s0 = inlined_call_operand.vmem [shape: f32[2,16,8], index: 0, kind: input, shape index: {}]   ;;  %s501_s1 = inlined_call_operand.vmem [shape: f32[2,3,8], index: 1, kind: input, shape index: {}]   ;;  %s502_s2 = inlined_call_operand.vmem [shape: f32[2,16,8], index: 2, kind: output, shape index: {}]  }
   0x1   :  { %s454_s11 = smov 0  }
   0x2 LB: > { %s24_s12 = sadd.s32 1, %s429_s10  ;;  %p373_p0 = scmp.ge.s32.totalorder %s433_s11, 1  ;;  %s433_s11 = sphi %s454_s11, %s12_s11   ;;  %s429_s10 = sphi %s452_s10, %s504_s10   ;;  %s425_s9 = sphi %s450_s9, %s503_s9  }
   0x3   : > { %p26_p1 = scmp.ge.s32.totalorder %s24_s12, 2  ;;  %p145_p2 = scmp.lt.s32.totalorder %s433_s11, 3 }
   0x5   : > { %s506_s12 = smov (%p26_p1, %s24_s12), 0  ;;  %p146_p3 = pnand %p373_p0, %p145_p2 }
   0x6   : > { %p180_p4 = scmp.lt.s32.totalorder (!%p146_p3), %s425_s9, 1  ;;  %vm205_vm0 = vcmask (!%p146_p3), 64512   ;;  %v257_v35 = vlaneseq (!%p146_p3) }
   0x7   : > { %149 = sbr.rel (%p146_p3) target bundleno = 79 (0x4f), region = 28 }
   0x8   : > { %v258_v37 = vshrl.u32 (!%p146_p3), %v257_v35, 7 }
   0xa   : > { %v259_v44 = vsub.s32 (!%p146_p3), 2, %v258_v37 }
   0xe   : > { %s508_s9 = smov (!%p180_p4, %s425_s9), 1 }
   0xf   : > { %s381_s13 = sshll.u32 %s508_s9, 4  ;;  %s376_s17 = sshll.u32 %s508_s9, 2 }
  0x10   : > { %s187_s16 = scalar_lea.vmem %s500_s0, %s381_s13  ;;  %s194_s20 = scalar_lea.vmem %s501_s1, %s376_s17 }
  0x11   : > { %v203_v0 = vld [vmem:[%s187_s16] sm:$0xff]  ;;  %v204_v1 = vld [vmem:[%s187_s16 + $0x8] sm:$0xff]  ;;  %s202_s23 = scalar_lea.vmem %s502_s2, %s381_s13 }
  0x12   : > { %v206_v2 = vsel %vm205_vm0, %v203_v0, 0.0  ;;  %v207_v3 = vsel %vm205_vm0, %v204_v1, 0.0  ;;  %v215_v4 = vmul.f32 %v203_v0, %v203_v0  ;;  %v216_v5 = vmul.f32 %v204_v1, %v204_v1  ;;  %v231_v26 = vld [vmem:[%s194_s20] sm:$0x7] }
  0x13   : > { %v208_v6 = vadd.f32 %v207_v3, %v206_v2 }
  0x14   : > { %v217_v7 = vsel %vm205_vm0, %v215_v4, 0.0  ;;  %v218_v8 = vsel %vm205_vm0, %v216_v5, 0.0 }
  0x15   : > { %v209_v9 = vrot.slane %v208_v6, 4  ;;  %v219_v10 = vadd.f32 %v218_v8, %v217_v7 }
  0x17   : > { %v210_v11 = vadd.f32 %v209_v9, %v208_v6  ;;  %v220_v12 = vrot.slane %v219_v10, 4 }
  0x19   : > { %v211_v13 = vrot.slane %v210_v11, 2  ;;  %v221_v14 = vadd.f32 %v220_v12, %v219_v10 }
  0x1b   : > { %v212_v15 = vadd.f32 %v211_v13, %v210_v11  ;;  %v222_v16 = vrot.slane %v221_v14, 2 }
  0x1d   : > { %v213_v17 = vrot.slane %v212_v15, 1  ;;  %v223_v18 = vadd.f32 %v222_v16, %v221_v14 }
  0x1f   : > { %v214_v19 = vadd.f32 %v213_v17, %v212_v15  ;;  %v224_v20 = vrot.slane %v223_v18, 1 }
  0x21   : > { %v225_v21 = vadd.f32 %v224_v20, %v223_v18  ;;  %v226_v22 = vmul.f32 0.0625, %v214_v19 }
  0x23   : > { %v227_v23 = vmul.f32 %v226_v22, %v214_v19  ;;  %v232_v34 = vsub.f32 %v231_v26, %v226_v22 }
  0x25   : > { %v228_v24 = vsub.f32 %v225_v21, %v227_v23  ;;  %v234_v36 = vrot.slane %v232_v34, 6 }
  0x27   : > { %v229_v25 = vmul.f32 0.06666667, %v228_v24  ;;  %v236_v40 = vmul.f32 %v234_v36, %v231_v26 }
  0x29   : > { %v230_v27 = vmax.f32 %v229_v25, 0.0  ;;  %v237_v46 = vadd.f32 %v236_v40, %v226_v22 }
  0x2b   : > { %v238_v28 = vsub.f32 %v231_v26, %v230_v27  ;;  %v252_v33 = vadd.f32 1e-05, %v230_v27 }
  0x2d   : > { %v240_v29 = vrot.slane %v238_v28, 7 }
  0x2f   : > { %v242_v30 = vmul.f32 %v240_v29, %v231_v26 }
  0x31   : > { %v243_v31 = vadd.f32 %v242_v30, %v230_v27 }
  0x33   : > { %v244_v32 = vadd.f32 1e-05, %v243_v31 }
  0x35   : > { %407 = vrsqrt.f32 %v244_v32  ;;  %vm247_vm1 = vcmp.eq.f32.partialorder %v244_v32, inf  ;;  %v250_v39 = vand.u32 2147483648, %v244_v32  ;;  %vm249_vm2 = vcmp.eq.f32.partialorder %v244_v32, 0.0 }
  0x36   : > { %409 = vrsqrt.f32 %v252_v33 }
  0x3f   : > { %v408_v38 = vpop.eup %407 }
  0x40   : > { %v246_v41 = vmul.f32 %v408_v38, %v244_v32  ;;  %v410_v42 = vpop.eup %409 }
  0x42   : > { %v248_v43 = vsel %vm247_vm1, %v244_v32, %v246_v41 }
  0x43   : > { %v251_v45 = vsel %vm249_vm2, %v250_v39, %v248_v43 }
  0x44   : > { %v254_v47 = vmul.f32 %v410_v42, %v251_v45 }
  0x46   : > { %v255_v48 = vmul.f32 %v254_v47, %v226_v22  ;;  %v260_v49 = vrot.slane %v254_v47, %v259_v44 }
  0x48   : > { %v256_v50 = vsub.f32 %v237_v46, %v255_v48  ;;  %v261_v51 = vmul.f32 %v260_v49, %v203_v0  ;;  %v262_v52 = vmul.f32 %v260_v49, %v204_v1 }
  0x4a   : > { %v266_v53 = vrot.slane %v256_v50, %v259_v44 }
  0x4c   : > { %v267_v54 = vadd.f32 %v266_v53, %v261_v51  ;;  %v268_v55 = vadd.f32 %v266_v53, %v262_v52 }
  0x4e   : > { %269 = vst.msk [vmem:[%s202_s23] sm:$0xff] %vm205_vm0, %v267_v54  ;;  %270 = vst.msk [vmem:[%s202_s23 + $0x8] sm:$0xff] %vm205_vm0, %v268_v55 }
  0x4f PF: > { %s12_s11 = sadd.s32 1, %s433_s11   ;;  %s503_s9 = smov %s429_s10 }
  0x50   : > { %p9_p5 = scmp.ge.s32.totalorder %s12_s11, 4   ;;  %s504_s10 = smov %s506_s12 }
  0x52   :  { %11 = sbr.rel (!%p9_p5) target bundleno = 2 (0x2), region = 61 }

</bundles_post_ra>
